<compile_context>
chip_gen: v7x
topology: tpu7x:2x2x1
jax: 0.10.0
libtpu: 0.0.40
codegen_flags: <defaults>
</compile_context>

<pallas_src>
import jax
import jax.numpy as jnp
from jax.experimental import pallas as pl
from jax.experimental.pallas import tpu as pltpu


_SUB = 8                          # sublanes per f32 vreg; one channel = 8 dense rows
_MAX_TILE_LANES = 1024 * 128      # 131072 lanes/step -> ~10 MiB pipelined footprint


def _preprocess_kernel(img_ref, out_ref):
    # img_ref: (8, T) float32 slab of ONE RGB channel (channel flip is done in
    #          the input BlockSpec index_map, not here).
    # out_ref: (8, T) uint8 slab of the corresponding BGR output channel.
    x = img_ref[...]
    y = jnp.minimum(x * 255.0, 255.0)
    # torch .mul(255).byte(): truncation toward zero; f32 -> i32 -> u8 is the
    # robust Mosaic lowering path for the narrow-int cast.
    out_ref[...] = y.astype(jnp.int32).astype(jnp.uint8)


def deepface_preprocess(image_chw: jax.Array,
                        max_tile_lanes: int = _MAX_TILE_LANES) -> jax.Array:
    """mul(255).byte() + RGB->BGR.  Returns (C, H, W) uint8 in BGR order."""
    C, H, W = image_chw.shape
    hw = H * W

    # 8-sublane-dense layout: channel c occupies rows [8c, 8c+8).
    pad = (-hw) % _SUB
    x = image_chw.reshape(C, hw)
    if pad:
        # Rare odd-sized frames only (H*W not a multiple of 8).
        x = jnp.pad(x, ((0, 0), (0, pad)))
    cols = (hw + pad) // _SUB
    x = x.reshape(C * _SUB, cols)

    # One spatial tile for the common small-frame case; lane-dense multi-MiB
    # tiles (multiple of 128) for large frames.
    tile = cols if cols <= max_tile_lanes else max_tile_lanes
    grid = (C, pl.cdiv(cols, tile))

    out = pl.pallas_call(
        _preprocess_kernel,
        out_shape=jax.ShapeDtypeStruct((C * _SUB, cols), jnp.uint8),
        grid=grid,
        # Channel flip (RGB -> BGR) lives entirely in DMA addressing:
        in_specs=[pl.BlockSpec((_SUB, tile), lambda c, s: (C - 1 - c, s))],
        out_specs=pl.BlockSpec((_SUB, tile), lambda c, s: (c, s)),
        compiler_params=pltpu.CompilerParams(
            # Fully independent tiles; lets v7x shard a large grid across its
            # two TensorCores, harmless on single-core v5e/v6e.
            dimension_semantics=("parallel", "parallel"),
        ),
    )(x)

    out = out.reshape(C, hw + pad)
    if pad:
        out = out[:, :hw]
    return out.reshape(C, H, W)


def deepfacemodel_forward(image: jax.Array):
    """JAX/Pallas equivalent of Deepfacemodel.forward.

    image: (B, 3, H, W) float32, NCHW, RGB, values in [0, 1].
    Returns (scores, bgr_chw):
      scores:  (1, 2) float32  -- [woman_score, man_score]
      bgr_chw: (3, H, W) uint8 -- quantized, BGR channel order (lane-dense CHW;
               transpose to HWC only where a consumer actually needs it).
    """
    # Empty-batch short circuit (static shape in JAX, like `image.shape[0] == 0`).
    if image.shape[0] == 0:
        return jnp.array([[0.5, 0.5]], dtype=jnp.float32), None

    image_tensor = image[0]                        # (3, H, W) float32, RGB
    bgr_chw = deepface_preprocess(image_tensor)    # (3, H, W) uint8, BGR

    # TODO(synk): DeepFace.analyze(actions=['gender']) runs an external
    # pretrained CNN (VGG-Face gender head) whose weights are not part of this
    # module; no in-script Pallas equivalent, so return the neutral fallback
    # scores [[0.5, 0.5]] instead of fabricating a classifier.
    scores = jnp.array([[0.5, 0.5]], dtype=jnp.float32)
    return scores, bgr_chw


def _reference_preprocess(image_chw: jax.Array) -> jax.Array:
    """Pure-JAX reference: mul(255).byte() then RGB->BGR, still CHW."""
    return jnp.clip(jnp.floor(image_chw * 255.0), 0, 255).astype(jnp.uint8)[::-1, :, :]


if __name__ == "__main__":
    key = jax.random.PRNGKey(0)
    B, C, H, W = 2, 3, 16, 16
    image = jax.random.uniform(key, (B, C, H, W), dtype=jnp.float32)

    scores, bgr_chw = deepfacemodel_forward(image)
    jax.block_until_ready(scores)
    jax.block_until_ready(bgr_chw)

    assert scores.shape == (1, 2) and scores.dtype == jnp.float32
    assert bgr_chw.shape == (C, H, W) and bgr_chw.dtype == jnp.uint8
    assert bool(jnp.all(bgr_chw == _reference_preprocess(image[0])))

    # HWC view that cv2/DeepFace would consume (plain JAX glue, outside forward).
    hwc = jnp.transpose(bgr_chw, (1, 2, 0))
    assert hwc.shape == (H, W, C) and hwc.dtype == jnp.uint8
    assert bool(jnp.all(hwc == jnp.transpose(_reference_preprocess(image[0]), (1, 2, 0))))

    # Multi-tile path: lane axis split into several 128-lane blocks, grid (3, 4).
    img2 = jax.random.uniform(jax.random.PRNGKey(1), (3, 32, 128), dtype=jnp.float32)
    tiled = deepface_preprocess(img2, max_tile_lanes=128)
    jax.block_until_ready(tiled)
    assert bool(jnp.all(tiled == _reference_preprocess(img2)))

    # Ragged multi-tile path (partial last lane block handled by Pallas masking).
    img3 = jax.random.uniform(jax.random.PRNGKey(2), (3, 24, 56), dtype=jnp.float32)
    ragged = deepface_preprocess(img3, max_tile_lanes=128)
    jax.block_until_ready(ragged)
    assert bool(jnp.all(ragged == _reference_preprocess(img3)))

    # Odd-sized frame (H*W not a multiple of 8 -> pad/slice fallback).
    img4 = jax.random.uniform(jax.random.PRNGKey(3), (3, 5, 10), dtype=jnp.float32)
    odd = deepface_preprocess(img4)
    jax.block_until_ready(odd)
    assert bool(jnp.all(odd == _reference_preprocess(img4)))

    # Empty-batch branch.
    empty_scores, _ = deepfacemodel_forward(jnp.zeros((0, C, H, W), jnp.float32))
    assert empty_scores.shape == (1, 2)

    print("KERNEL_OK")
</pallas_src>

<mosaic_0001>
module attributes {stable_mosaic.version = 11 : i64} {
  func.func @_preprocess_kernel(%arg0: i32, %arg1: i32, %arg2: memref<8x32xf32, #tpu.memory_space<vmem>>, %arg3: memref<8x32xi8, #tpu.memory_space<vmem>>) attributes {dimension_semantics = [#tpu.dimension_semantics<parallel>, #tpu.dimension_semantics<parallel>], iteration_bounds = array<i64: 3, 1>, scalar_prefetch = 0 : i64, scratch_operands = 0 : i64, tpu.core_type = #tpu.core_type<tc>, window_params = [{transform_indices = @transform_0, window_bounds = array<i64: 8, 32>}, {transform_indices = @transform_1, window_bounds = array<i64: 8, 32>}]} {
    %c0 = arith.constant 0 : index
    %c0_0 = arith.constant 0 : index
    %0 = vector.load %arg2[%c0, %c0_0] : memref<8x32xf32, #tpu.memory_space<vmem>>, vector<8x32xf32>
    %cst = arith.constant 2.550000e+02 : f32
    %1 = vector.broadcast %cst : f32 to vector<8x32xf32>
    %2 = arith.mulf %0, %1 : vector<8x32xf32>
    %cst_1 = arith.constant 2.550000e+02 : f32
    %3 = vector.broadcast %cst_1 : f32 to vector<8x32xf32>
    %4 = arith.minimumf %2, %3 : vector<8x32xf32>
    %5 = arith.fptosi %4 : vector<8x32xf32> to vector<8x32xi32>
    %6 = arith.trunci %5 : vector<8x32xi32> to vector<8x32xi8>
    %c0_2 = arith.constant 0 : index
    %c0_3 = arith.constant 0 : index
    %7 = vector.load %arg3[%c0_2, %c0_3] : memref<8x32xi8, #tpu.memory_space<vmem>>, vector<8x32xi8>
    tpu.vector_store %arg3[%c0_2, %c0_3], %6 {strides = array<i32>} : memref<8x32xi8, #tpu.memory_space<vmem>>, vector<8x32xi8>,
    return
  }
  func.func @transform_0(%arg0: i32, %arg1: i32) -> (i32, i32) {
    %c2_i32 = arith.constant 2 : i32
    %0 = arith.subi %c2_i32, %arg0 : i32
    %c0_i32 = arith.constant 0 : i32
    return %0, %arg1 : i32, i32
  }
  func.func @transform_1(%arg0: i32, %arg1: i32) -> (i32, i32) {
    %c0_i32 = arith.constant 0 : i32
    return %arg0, %arg1 : i32, i32
  }
}

</mosaic_0001>

<bundles_post_ra>
// kernel: tpu_custom_call.1
= control target key start
LH: loop header
LB: loop body
LE: loop exit
PB: predicated region body
PF: predicated region fallthrough
CT: control target
= control target key end

     0   :  { %6 = vsyncpa [#allocation3], 0  ;;  %s703_s0 = inlined_call_operand.hbm [shape: f32[24,32], index: 0, kind: input, shape index: {}]   ;;  %s704_s1 = inlined_call_operand.hbm [shape: u8[24,32], index: 1, kind: output, shape index: {}]  }
   0x1   :  { %8 = vsyncpa [#allocation3 + $0x1], 0 }
   0x2   :  { %9 = vsyncpa [#allocation4], 0 }
   0x3   :  { %11 = vsyncpa [#allocation4 + $0x1], 0  ;;  %s507_s6 = smov 0   ;;  %s509_s7 = smov 0  }
   0x4   :  { %s511_s8 = smov 0   ;;  %s513_s9 = smov 0  }
   0x5   :  { %s515_s10 = smov 0   ;;  %s517_s11 = smov 0  }
   0x6   :  { %s519_s12 = smov 0   ;;  %s521_s13 = smov 0  }
   0x7   :  { %s523_s14 = smov 0  }
   0x8 LB: > { %s256_s15 = sadd.s32 4294967295, %s493_s14   ;;  %s257_s16 = sadd.s32 4294967294, %s493_s14   ;;  %s493_s14 = sphi %s523_s14, %s17_s14   ;;  %s489_s13 = sphi %s521_s13, %s722_s13   ;;  %s485_s12 = sphi %s519_s12, %s721_s12   ;;  %s481_s11 = sphi %s517_s11, %s720_s11   ;;  %s477_s10 = sphi %s515_s10, %s719_s10   ;;  %s473_s9 = sphi %s513_s9, %s718_s9   ;;  %s469_s8 = sphi %s511_s8, %s717_s8   ;;  %s465_s7 = sphi %s509_s7, %s716_s7   ;;  %s461_s6 = sphi %s507_s6, %s715_s6  }
   0x9   : > { %s29_s17 = sadd.s32 1, %s489_s13  ;;  %s33_s18 = ssub.s32 2, %s489_s13 }
   0xa   : > { %p31_p0 = scmp.ge.s32.totalorder %s29_s17, 3  ;;  %s40_s19 = sadd.s32 1, %s481_s11 }
   0xb   : > { %p47_p1 = scmp.ne.s32.totalorder %s481_s11, %s477_s10  ;;  %p48_p2 = scmp.eq.s32.totalorder %s493_s14, 0 }
   0xc   : > { %s724_s17 = smov (%p31_p0, %s29_s17), 0  ;;  %p53_p4 = scmp.ne.s32.totalorder %s477_s10, %s473_s9 }
   0xd   : > { %p560_p3 = por %p48_p2, %p47_p1  ;;  %s34_s21 = ssub.s32 2, %s724_s17 }
   0xe   : > { %p54_p5 = scmp.eq.s32.totalorder %s256_s15, 0  ;;  %s35_s22 = ssub.s32 %s33_s18, %s34_s21 }
   0xf   : > { %s63_s23 = ssub.s32 %s489_s13, %s724_s17  ;;  %p38_p6 = scmp.eq.s32.totalorder %s35_s22, 0 }
  0x10   : > { %p568_p7 = por %p54_p5, %p53_p4  ;;  %p66_p8 = scmp.eq.s32.totalorder %s63_s23, 0 }
  0x11   : > { %s68_s25 = sadd.s32 1, %s469_s8  ;;  %p78_p9 = scmp.ne.s32.totalorder %s469_s8, %s465_s7 }
  0x12   : > { %s574_s26 = scalar_select %p38_p6, %s481_s11, %s40_s19  }
  0x13   : > { %s577_s27 = scalar_select %p66_p8, %s469_s8, %s68_s25  }
  0x14   : > { %p79_p10 = scmp.eq.s32.totalorder %s256_s15, 2  ;;  %p84_p11 = scmp.ne.s32.totalorder %s465_s7, %s461_s6 }
  0x15   : > { %p85_p12 = scmp.eq.s32.totalorder %s257_s16, 2  ;;  %p283_p1 = scmp.lt.s32.totalorder %s493_s14, 3 }
  0x16   : > { %p583_p13 = por %p79_p10, %p78_p9  ;;  %s105_s30 = sand.u32 1, %s481_s11  }
  0x17   : > { %p587_p0 = por %p85_p12, %p84_p11  ;;  %s261_s2 = sshll.u32 %s33_s18, 7 }
  0x18   : > { %s708_s28 = scalar_select %p583_p13, 1, 0 }
  0x19   : > { %s709_s29 = scalar_select %p587_p0, 1, 0 }
  0x1a   : > { %s260_s3 = sshll.u32 %s105_s30, 3  ;;  %s596_s9 = scalar_lea.hbm %s703_s0, %s261_s2 }
  0x1b   : > { %s109_s15 = scalar_lea.vmem [#allocation2], %s260_s3  ;;  %p600_p2 = pnand %p283_p1, %p560_p3 }
  0x1c   : > { %s118_s16 = sshll.u32 %s109_s15, 4  ;;  %s106_s18 = scalar_lea.sflag [#allocation3], %s105_s30  ;;  %s604_s16 = int_to_ptr.vmem [resolvable:$true] %s118_s16 }
  0x1d   : > { %s357_s21 = scalar_lea.hbm %s596_s9, 128  ;;  %p359_p8 = pneg %p600_p2 }
  0x1e   : > { %p358_p6 = scmp.ne.s32.totalorder %s596_s9, %s357_s21  ;;  %s362_s23 = scalar_lea.hbm %s703_s0, 384 }
  0x1f   : > { %p363_p3 = scmp.lt.u32.totalorder %s596_s9, %s703_s0  ;;  %p364_p11 = scmp.lt.u32.totalorder %s362_s23, %s357_s21 }
  0x20   : > { %p360_p9 = pnand %p359_p8, %p358_p6  ;;  %p366_p1 = scmp.lt.u32.totalorder %s357_s21, %s596_s9 }
  0x21   : > { %p365_p12 = por %p364_p11, %p363_p3 }
  0x22   : > { %p361_p10 = pneg %p360_p9 }
  0x23   : > { %p367_p4 = por %p366_p1, %p365_p12 }
  0x25   : > { %p368_p5 = pnand %p367_p4, %p361_p10 }
  0x27   : > { %371 = shalt.err (!%p368_p5)
}
  0x28   : > { %s372_s30 = scalar_lea.vmem %s604_s16, 128  ;;  %s495_s3 = smov [#allocation2]  }
  0x29   : > { %p373_p6 = scmp.ne.s32.totalorder %s604_s16, %s372_s30  ;;  %s377_s4 = sshll.u32 %s495_s3, 4  ;;  %s378_s4 = int_to_ptr.vmem [resolvable:$false] %s377_s4 }
  0x2a   : > { %s379_s5 = scalar_lea.vmem %s378_s4, 256  ;;  %p380_p13 = scmp.lt.s32.totalorder %s604_s16, %s378_s4 }
  0x2b   : > { %p375_p9 = pnand %p373_p6, %p359_p8  ;;  %p381_p3 = scmp.lt.s32.totalorder %s379_s5, %s372_s30 }
  0x2d   : > { %p376_p0 = pneg %p375_p9  ;;  %p382_p11 = por %p381_p3, %p380_p13 }
  0x2f   : > { %p383_p12 = pnand %p382_p11, %p376_p0 }
  0x31   : > { %386 = shalt.err (!%p383_p12)
}
  0x32   : > { %278 = dma.hbm_to_vmem [thread:$0]  (!%p600_p2), %s596_s9, 128, %s604_s16, %s106_s18  }
  0x33   : > { %p711_p4 = scmp.lt.s32.totalorder %s493_s14, 4  ;;  %p712_p5 = scmp.ge.s32.totalorder %s493_s14, 1 }
  0x35   : > { %p124_p8 = pnand %p712_p5, %p711_p4 }
  0x36   : > { %s129_s15 = sand.u32 (!%p124_p8), 1, %s477_s10  }
  0x37   : > { %127 = sbr.rel (%p124_p8) target bundleno = 90 (0x5a), region = 24  ;;  %s263_s21 = sshll.u32 (!%p124_p8), %s129_s15, 3 }
  0x38   : > { %s130_s20 = scalar_lea.sflag (!%p124_p8), [#allocation3], %s129_s15  ;;  %s133_s22 = scalar_lea.vmem (!%p124_p8), [#allocation2], %s263_s21 }
  0x3e   : > { %452 = dma.done.wait (%p568_p7), %s130_s20, 128  }
  0x3f   : > { %454 = vsyncadd (%p568_p7), %s130_s20, 4294967168  ;;  %s149_s19 = sand.u32 1, %s465_s7   ;;  %v153_v0 = vld [vmem:[%s133_s22] sm:$0xff]  ;;  %s266_s23 = sshll.u32 %s485_s12, 5  ;;  %vm159_vm0 = vcmask 254976  }
  0x40   : > { %v154_v1 = vmul.f32 255.0, %v153_v0  ;;  %s264_s9 = sshll.u32 %s149_s19, 1  ;;  %s649_s2 = scalar_lea.hbm %s704_s1, %s266_s23 }
  0x41   : > { %s151_s16 = scalar_lea.vmem [#allocation5], %s264_s9  ;;  %s162_s30 = scalar_lea.sflag [#allocation4], %s149_s19 }
  0x42   : > { %v155_v2 = vmin.f32 %v154_v1, 255.0  ;;  %s176_s18 = sshll.u32 %s151_s16, 4  ;;  %p713_p13 = scmp.ne.s32.totalorder %s708_s28, 0  ;;  %s644_s18 = int_to_ptr.vmem [resolvable:$true] %s176_s18 }
  0x43   : > { %s387_s3 = scalar_lea.vmem %s644_s18, 32  ;;  %s496_s12 = smov [#allocation5]  }
  0x44   : > { %v269_v3 = vtrunc.f32 %v155_v2  ;;  %p388_p7 = scmp.ne.s32.totalorder %s644_s18, %s387_s3  ;;  %s391_s4 = sshll.u32 %s496_s12, 4  ;;  %s392_s4 = int_to_ptr.vmem [resolvable:$false] %s391_s4 }
  0x45   : > { %s393_s5 = scalar_lea.vmem %s392_s4, 64  ;;  %p394_p10 = scmp.lt.s32.totalorder %s644_s18, %s392_s4 }
  0x46   : > { %v270_v4 = vcvt.f32.s32 %v269_v3  ;;  %p389_p0 = pnand %p388_p7, %p713_p13  ;;  %p395_p1 = scmp.lt.s32.totalorder %s393_s5, %s387_s3 }
  0x48   : > { %v157_v5 = vpack.c.b16 %v270_v4, %v270_v4  ;;  %p390_p2 = pneg %p389_p0  ;;  %p396_p6 = por %p395_p1, %p394_p10 }
  0x4a   : > { %v158_v6 = vpack.c.b8 %v157_v5, %v157_v5  ;;  %p397_p9 = pnand %p396_p6, %p390_p2 }
  0x4c   : > { %160 = vst.msk [vmem:[%s151_s16] sm:$0x3] %vm159_vm0, %v158_v6 }
  0x4d   : > { %400 = shalt.err (!%p397_p9)
}
  0x4e   : > { %s401_s15 = scalar_lea.hbm %s649_s2, 32  ;;  %s405_s22 = scalar_lea.hbm %s704_s1, 96 }
  0x4f   : > { %p402_p3 = scmp.ne.s32.totalorder %s649_s2, %s401_s15  ;;  %p406_p4 = scmp.lt.u32.totalorder %s649_s2, %s704_s1 }
  0x50   : > { %p407_p5 = scmp.lt.u32.totalorder %s405_s22, %s401_s15  ;;  %p409_p7 = scmp.lt.u32.totalorder %s401_s15, %s649_s2 }
  0x51   : > { %p403_p11 = pnand %p402_p3, %p713_p13 }
  0x52   : > { %p408_p8 = por %p407_p5, %p406_p4 }
  0x53   : > { %p404_p12 = pneg %p403_p11 }
  0x54   : > { %p410_p0 = por %p409_p7, %p408_p8 }
  0x56   : > { %p411_p2 = pnand %p410_p0, %p404_p12 }
  0x58   : > { %414 = shalt.err (!%p411_p2)
}
  0x59   : > { %273 = dma.vmem_to_hbm [thread:$0]  (%p713_p13), %s644_s18, 32, %s649_s2, %s162_s30  }
  0x5a PF: > { %p284_p10 = scmp.ge.s32.totalorder %s493_s14, 2  ;;  %s188_s16 = sand.u32 1, %s461_s6  }
  0x5b   : > { %p714_p1 = scmp.ne.s32.totalorder %s709_s29, 0  ;;  %s189_s23 = scalar_lea.sflag [#allocation4], %s188_s16 }
  0x5d   : > { %p280_p6 = pnand %p284_p10, %p714_p1 }
  0x5f   : > { %456 = dma.done.wait (!%p280_p6), %s189_s23, 32  }
  0x60   : > { %458 = vsyncadd (!%p280_p6), %s189_s23, 4294967264  ;;  %s17_s14 = sadd.s32 1, %s493_s14   ;;  %s715_s6 = smov %s465_s7 }
  0x61   : > { %p14_p9 = scmp.ge.s32.totalorder %s17_s14, 5   ;;  %s716_s7 = smov %s469_s8 }
  0x62   : > { %s717_s8 = smov %s577_s27  ;;  %s718_s9 = smov %s477_s10 }
  0x63   : > { %s719_s10 = smov %s481_s11  ;;  %s720_s11 = smov %s574_s26 }
  0x64   : > { %s721_s12 = smov %s489_s13  ;;  %s722_s13 = smov %s724_s17 }
  0x65   :  { %16 = sbr.rel (!%p14_p9) target bundleno = 8 (0x8), region = 69 }
  0x6c   :  { %194 = vsyncpa [#allocation3], 1 }
  0x6d   :  { %196 = vsyncpa [#allocation3 + $0x1], 1 }
  0x6e   :  { %197 = vsyncpa [#allocation4], 1 }
  0x6f   :  { %199 = vsyncpa [#allocation4 + $0x1], 1 }

</bundles_post_ra>
